<compile_context>
chip_gen: v5e
topology: v5e:2x2
jax: 0.10.0
libtpu: 0.0.40
codegen_flags: <defaults>
</compile_context>

<pallas_src>
import functools

import jax
import jax.numpy as jnp
from jax.experimental import pallas as pl
from jax.experimental.pallas import tpu as pltpu

_LANE = 128


def _layernorm_c_kernel(x_ref, g_ref, b_ref, o_ref, *, eps, inv_c):
    """LayerNorm over channels for one (Bt, C, S, 128) tile.

    x_ref : (Bt, C, S, 128)  spatial rows on sublanes, positions on lanes
    g_ref : (C, 1, 1)        LayerNorm weight (f32)
    b_ref : (C, 1, 1)        LayerNorm bias   (f32)
    o_ref : (Bt, C, S, 128)
    """
    x = x_ref[...].astype(jnp.float32)                       # (Bt, C, S, 128)
    mean = jnp.sum(x, axis=1, keepdims=True) * inv_c          # VPU adds, no XLU
    xc = x - mean
    var = jnp.sum(xc * xc, axis=1, keepdims=True) * inv_c     # biased var (PyTorch)
    inv_std = jax.lax.rsqrt(var + eps)                        # EUP
    g = g_ref[...][None]                                      # (1, C, 1, 1)
    b = b_ref[...][None]
    o_ref[...] = ((xc * inv_std) * g + b).astype(o_ref.dtype)


def _choose_tiles(B, C, R, itemsize, target_bytes=2 << 20):
    """Pick (Bt, S, n_s): ~target_bytes per input block, (8,128)-legal shapes."""
    row_bytes = C * _LANE * itemsize
    if R < 8:
        S = R                                    # full dim: allowed by (8,128) rule
    else:
        s_cap = max(8, (target_bytes // row_bytes) // 8 * 8)
        S = max(8, min((R // 8) * 8, s_cap))     # multiple of 8
    n_s = -(-R // S)                             # cdiv; partial last tile is masked
    Bt = 1
    if n_s == 1:                                 # spatial alone too small: fold batch
        blk = S * row_bytes
        budget = max(1, target_bytes // max(blk, 1))
        for cand in range(min(B, budget), 0, -1):
            # keep >= 2 total grid steps when possible (v7x has 2 TensorCores)
            if B % cand == 0 and (B // cand) * n_s >= min(2, B * n_s):
                Bt = cand
                break
    return Bt, S, n_s


def layer_norm_proxy(x_nchw, gamma, beta, eps=1e-5):
    """Equivalent of LayerNormProxy.forward on an NCHW tensor."""
    B, C, H, W = x_nchw.shape
    HW = H * W
    HW_pad = -(-HW // _LANE) * _LANE

    x2 = x_nchw.reshape(B, C, HW)                # contiguous reshape, no transpose
    if HW_pad != HW:
        x2 = jnp.pad(x2, ((0, 0), (0, 0), (0, HW_pad - HW)))
    R = HW_pad // _LANE
    x4 = x2.reshape(B, C, R, _LANE)

    itemsize = jnp.dtype(x_nchw.dtype).itemsize
    Bt, S, n_s = _choose_tiles(B, C, R, itemsize)
    grid = (B // Bt, n_s)

    g = gamma.astype(jnp.float32).reshape(C, 1, 1)
    b = beta.astype(jnp.float32).reshape(C, 1, 1)

    kernel = functools.partial(_layernorm_c_kernel, eps=float(eps), inv_c=1.0 / C)
    cost = pl.CostEstimate(
        flops=7 * B * C * HW_pad,
        transcendentals=B * HW_pad,
        bytes_accessed=2 * B * C * HW_pad * itemsize + 2 * C * 4,
    )

    out = pl.pallas_call(
        kernel,
        out_shape=jax.ShapeDtypeStruct((B, C, R, _LANE), x_nchw.dtype),
        grid=grid,
        in_specs=[
            pl.BlockSpec((Bt, C, S, _LANE), lambda bi, si: (bi, 0, si, 0)),
            pl.BlockSpec((C, 1, 1), lambda bi, si: (0, 0, 0)),
            pl.BlockSpec((C, 1, 1), lambda bi, si: (0, 0, 0)),
        ],
        out_specs=pl.BlockSpec((Bt, C, S, _LANE), lambda bi, si: (bi, 0, si, 0)),
        compiler_params=pltpu.CompilerParams(
            dimension_semantics=("parallel", "parallel"),
            vmem_limit_bytes=32 * 1024 * 1024,
        ),
        cost_estimate=cost,
    )(x4, g, b)

    out = out.reshape(B, C, HW_pad)
    if HW_pad != HW:
        out = out[:, :, :HW]
    return out.reshape(B, C, H, W)


def layer_norm_proxy_reference(x_nchw, gamma, beta, eps=1e-5):
    """Pure-JAX reference matching the PyTorch module exactly."""
    x = jnp.transpose(x_nchw, (0, 2, 3, 1))          # b c h w -> b h w c
    mean = jnp.mean(x, axis=-1, keepdims=True)
    var = jnp.mean((x - mean) ** 2, axis=-1, keepdims=True)
    y = (x - mean) / jnp.sqrt(var + eps) * gamma + beta
    return jnp.transpose(y, (0, 3, 1, 2))            # b h w c -> b c h w


if __name__ == "__main__":
    # LayerNormProxy(dim=C) applied to a small NCHW feature map.
    B, C, H, W = 2, 4, 16, 16
    key = jax.random.PRNGKey(0)
    kx, kg, kb = jax.random.split(key, 3)

    x = jax.random.normal(kx, (B, C, H, W), jnp.float32)
    gamma = 1.0 + 0.1 * jax.random.normal(kg, (C,), jnp.float32)   # norm.weight
    beta = 0.1 * jax.random.normal(kb, (C,), jnp.float32)          # norm.bias

    out = jax.block_until_ready(layer_norm_proxy(x, gamma, beta))
    ref = jax.block_until_ready(layer_norm_proxy_reference(x, gamma, beta))

    assert out.shape == (B, C, H, W), out.shape
    max_err = float(jnp.max(jnp.abs(out - ref)))
    assert jnp.allclose(out, ref, atol=1e-4, rtol=1e-4), max_err

    print("KERNEL_OK")
</pallas_src>

<mosaic_0001>
module attributes {stable_mosaic.version = 11 : i64} {
  func.func @_layernorm_c_kernel(%arg0: i32, %arg1: i32, %arg2: memref<1x4x2x128xf32, #tpu.memory_space<vmem>>, %arg3: memref<4x1x1xf32, #tpu.memory_space<vmem>>, %arg4: memref<4x1x1xf32, #tpu.memory_space<vmem>>, %arg5: memref<1x4x2x128xf32, #tpu.memory_space<vmem>>) attributes {dimension_semantics = [#tpu.dimension_semantics<parallel>, #tpu.dimension_semantics<parallel>], iteration_bounds = array<i64: 2, 1>, scalar_prefetch = 0 : i64, scratch_operands = 0 : i64, tpu.core_type = #tpu.core_type<tc>, window_params = [{transform_indices = @transform_0, window_bounds = array<i64: 1, 4, 2, 128>}, {pipeline_mode = #tpu.pipeline_mode<synchronous>, transform_indices = @transform_1, window_bounds = array<i64: 4, 1, 1>}, {pipeline_mode = #tpu.pipeline_mode<synchronous>, transform_indices = @transform_2, window_bounds = array<i64: 4, 1, 1>}, {transform_indices = @transform_3, window_bounds = array<i64: 1, 4, 2, 128>}]} {
    %c0 = arith.constant 0 : index
    %c0_0 = arith.constant 0 : index
    %c0_1 = arith.constant 0 : index
    %c0_2 = arith.constant 0 : index
    %0 = vector.load %arg2[%c0, %c0_0, %c0_1, %c0_2] : memref<1x4x2x128xf32, #tpu.memory_space<vmem>>, vector<1x4x2x128xf32>
    %cst = arith.constant dense<0.000000e+00> : vector<1x2x128xf32>
    %1 = vector.multi_reduction <add>, %0, %cst [1] : vector<1x4x2x128xf32> to vector<1x2x128xf32>
    %2 = vector.shape_cast %1 : vector<1x2x128xf32> to vector<1x1x2x128xf32>
    %cst_3 = arith.constant 2.500000e-01 : f32
    %3 = vector.broadcast %cst_3 : f32 to vector<1x1x2x128xf32>
    %4 = arith.mulf %2, %3 : vector<1x1x2x128xf32>
    %5 = vector.broadcast %4 : vector<1x1x2x128xf32> to vector<1x4x2x128xf32>
    %6 = arith.subf %0, %5 : vector<1x4x2x128xf32>
    %7 = arith.mulf %6, %6 : vector<1x4x2x128xf32>
    %cst_4 = arith.constant dense<0.000000e+00> : vector<1x2x128xf32>
    %8 = vector.multi_reduction <add>, %7, %cst_4 [1] : vector<1x4x2x128xf32> to vector<1x2x128xf32>
    %9 = vector.shape_cast %8 : vector<1x2x128xf32> to vector<1x1x2x128xf32>
    %cst_5 = arith.constant 2.500000e-01 : f32
    %10 = vector.broadcast %cst_5 : f32 to vector<1x1x2x128xf32>
    %11 = arith.mulf %9, %10 : vector<1x1x2x128xf32>
    %cst_6 = arith.constant 9.99999974E-6 : f32
    %12 = vector.broadcast %cst_6 : f32 to vector<1x1x2x128xf32>
    %13 = arith.addf %11, %12 : vector<1x1x2x128xf32>
    %14 = math.rsqrt %13 : vector<1x1x2x128xf32>
    %c0_7 = arith.constant 0 : index
    %c0_8 = arith.constant 0 : index
    %c0_9 = arith.constant 0 : index
    %15 = vector.load %arg3[%c0_7, %c0_8, %c0_9] : memref<4x1x1xf32, #tpu.memory_space<vmem>>, vector<4x1x1xf32>
    %16 = vector.shape_cast %15 : vector<4x1x1xf32> to vector<1x4x1x1xf32>
    %c0_10 = arith.constant 0 : index
    %c0_11 = arith.constant 0 : index
    %c0_12 = arith.constant 0 : index
    %17 = vector.load %arg4[%c0_10, %c0_11, %c0_12] : memref<4x1x1xf32, #tpu.memory_space<vmem>>, vector<4x1x1xf32>
    %18 = vector.shape_cast %17 : vector<4x1x1xf32> to vector<1x4x1x1xf32>
    %19 = vector.broadcast %14 : vector<1x1x2x128xf32> to vector<1x4x2x128xf32>
    %20 = arith.mulf %6, %19 : vector<1x4x2x128xf32>
    %21 = vector.broadcast %16 : vector<1x4x1x1xf32> to vector<1x4x2x128xf32>
    %22 = arith.mulf %20, %21 : vector<1x4x2x128xf32>
    %23 = vector.broadcast %18 : vector<1x4x1x1xf32> to vector<1x4x2x128xf32>
    %24 = arith.addf %22, %23 : vector<1x4x2x128xf32>
    %c0_13 = arith.constant 0 : index
    %c0_14 = arith.constant 0 : index
    %c0_15 = arith.constant 0 : index
    %c0_16 = arith.constant 0 : index
    %25 = vector.load %arg5[%c0_13, %c0_14, %c0_15, %c0_16] : memref<1x4x2x128xf32, #tpu.memory_space<vmem>>, vector<1x4x2x128xf32>
    tpu.vector_store %arg5[%c0_13, %c0_14, %c0_15, %c0_16], %24 {strides = array<i32>} : memref<1x4x2x128xf32, #tpu.memory_space<vmem>>, vector<1x4x2x128xf32>,
    return
  }
  func.func @transform_0(%arg0: i32, %arg1: i32) -> (i32, i32, i32, i32) {
    %c0_i32 = arith.constant 0 : i32
    %c0_i32_0 = arith.constant 0 : i32
    %c0_i32_1 = arith.constant 0 : i32
    return %arg0, %c0_i32, %arg1, %c0_i32_0 : i32, i32, i32, i32
  }
  func.func @transform_1(%arg0: i32, %arg1: i32) -> (i32, i32, i32) {
    %c0_i32 = arith.constant 0 : i32
    %c0_i32_0 = arith.constant 0 : i32
    %c0_i32_1 = arith.constant 0 : i32
    %c0_i32_2 = arith.constant 0 : i32
    return %c0_i32, %c0_i32_0, %c0_i32_1 : i32, i32, i32
  }
  func.func @transform_2(%arg0: i32, %arg1: i32) -> (i32, i32, i32) {
    %c0_i32 = arith.constant 0 : i32
    %c0_i32_0 = arith.constant 0 : i32
    %c0_i32_1 = arith.constant 0 : i32
    %c0_i32_2 = arith.constant 0 : i32
    return %c0_i32, %c0_i32_0, %c0_i32_1 : i32, i32, i32
  }
  func.func @transform_3(%arg0: i32, %arg1: i32) -> (i32, i32, i32, i32) {
    %c0_i32 = arith.constant 0 : i32
    %c0_i32_0 = arith.constant 0 : i32
    %c0_i32_1 = arith.constant 0 : i32
    return %arg0, %c0_i32, %arg1, %c0_i32_0 : i32, i32, i32, i32
  }
}

</mosaic_0001>

<bundles_post_ra>
// kernel: tpu_custom_call.1
= control target key start
LH: loop header
LB: loop body
LE: loop exit
PB: predicated region body
PF: predicated region fallthrough
CT: control target
= control target key end

     0   :  { %8 = vsyncpa [#allocation3], 0  ;;  %s820_s0 = inlined_call_operand.hbm [shape: f32[2,4,2,128], index: 0, kind: input, shape index: {}]   ;;  %s821_s1 = inlined_call_operand.vmem [shape: f32[4,1,1], index: 1, kind: input, shape index: {}]   ;;  %s822_s2 = inlined_call_operand.vmem [shape: f32[4,1,1], index: 2, kind: input, shape index: {}]   ;;  %s823_s3 = inlined_call_operand.hbm [shape: f32[2,4,2,128], index: 3, kind: output, shape index: {}]  }
   0x1   :  { %10 = vsyncpa [#allocation3 + $0x1], 0 }
   0x2   :  { %11 = vsyncpa [#allocation4], 0 }
   0x3   :  { %13 = vsyncpa [#allocation4 + $0x1], 0  ;;  %s658_s12 = smov 0   ;;  %s660_s13 = smov 0  }
   0x4   :  { %s662_s14 = smov 0   ;;  %s664_s15 = smov 0  }
   0x5   :  { %s666_s16 = smov 0   ;;  %s668_s17 = smov 0  }
   0x6 LB: > { %s422_s18 = sadd.s32 4294967295, %s631_s17   ;;  %s423_s19 = sadd.s32 4294967294, %s631_s17   ;;  %s631_s17 = sphi %s668_s17, %s19_s17   ;;  %s627_s16 = sphi %s666_s16, %s832_s16   ;;  %s623_s15 = sphi %s664_s15, %s831_s15   ;;  %s619_s14 = sphi %s662_s14, %s830_s14   ;;  %s615_s13 = sphi %s660_s13, %s829_s13   ;;  %s611_s12 = sphi %s658_s12, %s828_s12  }
   0x7   : > { %s31_s20 = sadd.s32 1, %s627_s16  ;;  %s40_s21 = sadd.s32 1, %s619_s14 }
   0x8   : > { %p33_p0 = scmp.ge.s32.totalorder %s31_s20, 2  ;;  %p47_p1 = scmp.ne.s32.totalorder %s619_s14, %s615_s13 }
   0x9   : > { %p48_p2 = scmp.eq.s32.totalorder %s631_s17, 0  ;;  %p53_p3 = scmp.ne.s32.totalorder %s615_s13, %s611_s12 }
   0xa   : > { %s834_s20 = smov (%p33_p0, %s31_s20), 0  ;;  %p54_p5 = scmp.eq.s32.totalorder %s422_s18, 0 }
   0xb   : > { %p699_p4 = por %p48_p2, %p47_p1  ;;  %s35_s23 = ssub.s32 %s627_s16, %s834_s20 }
   0xc   : > { %p121_p6 = scmp.eq.s32.totalorder %s422_s18, 1  ;;  %p38_p7 = scmp.eq.s32.totalorder %s35_s23, 0 }
   0xd   : > { %p705_p8 = por %p54_p5, %p53_p3  ;;  %p127_p10 = scmp.eq.s32.totalorder %s423_s19, 1 }
   0xe   : > { %p709_p9 = por %p121_p6, %p47_p1  ;;  %p425_p12 = scmp.ge.s32.totalorder %s631_s17, 2 }
   0xf   : > { %s714_s26 = scalar_select %p38_p7, %s619_s14, %s40_s21  }
  0x10   : > { %p716_p11 = por %p127_p10, %p53_p3  ;;  %p451_p13 = scmp.lt.s32.totalorder %s631_s17, 2 }
  0x11   : > { %s153_s28 = sand.u32 1, %s619_s14   ;;  %s437_s30 = sshll.u32 %s627_s16, 3 }
  0x12   : > { %s426_s29 = sshll.u32 %s153_s28, 3  ;;  %s163_s6 = scalar_lea.hbm %s820_s0, %s437_s30 }
  0x13   : > { %s157_s7 = scalar_lea.vmem [#allocation2], %s426_s29  ;;  %s164_s9 = sshll.u32 %s163_s6, 4  ;;  %s165_s9 = int_to_ptr.hbm [resolvable:$true] %s164_s9 }
  0x14   : > { %s166_s8 = sshll.u32 %s157_s7, 4  ;;  %p444_p0 = pnand %p451_p13, %p699_p4  ;;  %s167_s8 = int_to_ptr.vmem [resolvable:$true] %s166_s8 }
  0x15   : > { %p429_p1 = scmp.ge.s32.totalorder %s631_s17, 1  ;;  %s154_s10 = scalar_lea.sflag [#allocation3], %s153_s28 }
  0x16   : > { %s633_s11 = smov 32   ;;  %s634_s18 = smov 2  }
  0x17   : > { %446 = dma.hbm_to_vmem [thread:$0]  (!%p444_p0), %s165_s9, 128, %s167_s8, %s154_s10, %s633_s11, %s633_s11, %s634_s18  }
  0x18   : > { %p174_p2 = scmp.lt.s32.totalorder %s631_s17, 3 }
  0x1a   : > { %p175_p3 = pnand %p429_p1, %p174_p2 }
  0x1b   : > { %s732_s19 = sand.u32 (!%p175_p3), 1, %s615_s13  }
  0x1c   : > { %178 = sbr.rel (%p175_p3) target bundleno = 174 (0xae), region = 32  ;;  %s430_s21 = sshll.u32 (!%p175_p3), %s732_s19, 3 }
  0x1d   : > { %s181_s23 = scalar_lea.sflag (!%p175_p3), [#allocation3], %s732_s19  ;;  %s738_s22 = scalar_lea.vmem (!%p175_p3), [#allocation2], %s430_s21 }
  0x21   : > { %602 = dma.done.wait (%p705_p8), %s181_s23, 128  }
  0x22   : > { %604 = vsyncadd (%p705_p8), %s181_s23, 4294967168  ;;  %v635_v0 = vmov 0   ;;  %v509_v1 = vld [vmem:[%s821_s1 + $0x2] ss:$0 sm:$0xff]  ;;  %v510_v2 = vld [vmem:[%s821_s1] ss:$0 sm:$0xff] }
  0x23   : > { %507 = vset.pattern.permute.xlu1 %v635_v0  ;;  %506 = vset.pattern.permute.xlu0 %v635_v0  ;;  %v515_v3 = vld [vmem:[%s822_s2] ss:$0 sm:$0xff]  ;;  %v511_v4 = vld [vmem:[%s821_s1 + $0x3] ss:$0 sm:$0xff]  ;;  %v512_v5 = vld [vmem:[%s821_s1 + $0x1] ss:$0 sm:$0xff] }
  0x24   : > { %508 = vset.pattern.permute.xlu2 %v635_v0  ;;  %277 = vperm.xlu1 %507, %v509_v1   ;;  %v516_v6 = vld [vmem:[%s822_s2 + $0x1] ss:$0 sm:$0xff]  ;;  %v513_v7 = vld [vmem:[%s822_s2 + $0x3] ss:$0 sm:$0xff]  ;;  %v514_v8 = vld [vmem:[%s822_s2 + $0x2] ss:$0 sm:$0xff] }
  0x25   : > { %269 = vperm.xlu0 %506, %v510_v2   ;;  %297 = vperm.xlu2 %508, %v515_v3   ;;  %vm212_vm0 = vcmask 1041408   ;;  %v208_v9 = vld [vmem:[%s738_s22] sm:$0x3]  ;;  %v209_v10 = vld [vmem:[%s738_s22 + $0x2] sm:$0x3]  ;;  %s438_s30 = sshll.u32 %s623_s15, 3 }
  0x26   : > { %v213_v11 = vsel %vm212_vm0, %v208_v9, 0.0  ;;  %v214_v12 = vsel %vm212_vm0, %v209_v10, 0.0  ;;  %v210_v13 = vld [vmem:[%s738_s22 + $0x4] sm:$0x3]  ;;  %v211_v16 = vld [vmem:[%s738_s22 + $0x6] sm:$0x3]  ;;  %s333_s6 = scalar_lea.hbm %s823_s3, %s438_s30 }
  0x27   : > { %v215_v14 = vadd.f32 %v214_v12, %v213_v11  ;;  %v216_v15 = vsel %vm212_vm0, %v210_v13, 0.0  ;;  %v218_v18 = vsel %vm212_vm0, %v211_v16, 0.0  ;;  %s207_s22 = scalar_lea.vmem [#allocation5], %s430_s21  ;;  %s336_s7 = sshll.u32 %s333_s6, 4  ;;  %s337_s7 = int_to_ptr.hbm [resolvable:$true] %s336_s7 }
  0x28   : > { %s334_s24 = sshll.u32 %s207_s22, 4  ;;  %s321_s15 = scalar_lea.sflag [#allocation4], %s732_s19  ;;  %s335_s24 = int_to_ptr.vmem [resolvable:$true] %s334_s24 }
  0x29   : > { %v217_v17 = vadd.f32 %v216_v15, %v215_v14  ;;  %s563_s21 = sshra.s32 %s337_s7, 4  ;;  %s569_s11 = scalar_lea.hbm %s823_s3, 16  ;;  %s564_s21 = int_to_ptr.hbm [resolvable:$true] %s563_s21 }
  0x2a   : > { %s565_s8 = scalar_lea.hbm %s564_s21, 8  ;;  %p570_p7 = scmp.lt.s32.totalorder %s564_s21, %s823_s3 }
  0x2b   : > { %v219_v19 = vadd.f32 %v218_v18, %v217_v17  ;;  %p566_p4 = scmp.ne.s32.totalorder %s564_s21, %s565_s8  ;;  %p571_p8 = scmp.lt.s32.totalorder %s569_s11, %s565_s8 }
  0x2c   : > { %281 = vperm.xlu1 %507, %v511_v4  }
  0x2d   : > { %273 = vperm.xlu0 %506, %v512_v5   ;;  %301 = vperm.xlu2 %508, %v516_v6   ;;  %v220_v20 = vmul.f32 0.25, %v219_v19  ;;  %p567_p5 = pnand %p566_p4, %p709_p9  ;;  %p572_p10 = por %p571_p8, %p570_p7 }
  0x2f   : > { %v221_v21 = vsub.f32 %v208_v9, %v220_v20  ;;  %v222_v22 = vsub.f32 %v209_v10, %v220_v20  ;;  %v223_v23 = vsub.f32 %v210_v13, %v220_v20  ;;  %v224_v26 = vsub.f32 %v211_v16, %v220_v20  ;;  %p568_p6 = pneg %p567_p5 }
  0x31   : > { %v225_v24 = vmul.f32 %v221_v21, %v221_v21  ;;  %v226_v25 = vmul.f32 %v222_v22, %v222_v22  ;;  %v227_v27 = vmul.f32 %v223_v23, %v223_v23  ;;  %v228_v31 = vmul.f32 %v224_v26, %v224_v26  ;;  %p573_p13 = pnand %p572_p10, %p568_p6 }
  0x33   : > { %v229_v28 = vsel %vm212_vm0, %v225_v24, 0.0  ;;  %v230_v29 = vsel %vm212_vm0, %v226_v25, 0.0  ;;  %v232_v32 = vsel %vm212_vm0, %v227_v27, 0.0  ;;  %v234_v34 = vsel %vm212_vm0, %v228_v31, 0.0 }
  0x34   : > { %309 = vperm.xlu1 %507, %v513_v7   ;;  %v231_v30 = vadd.f32 %v230_v29, %v229_v28 }
  0x35   : > { %305 = vperm.xlu0 %506, %v514_v8  }
  0x36   : > { %v233_v33 = vadd.f32 %v232_v32, %v231_v30 }
  0x38   : > { %v235_v35 = vadd.f32 %v234_v34, %v233_v33 }
  0x3a   : > { %v236_v36 = vmul.f32 0.25, %v235_v35 }
  0x3c   : > { %v237_v37 = vadd.f32 1e-05, %v236_v36 }
  0x3e   : > { %517 = vrsqrt.f32 %v237_v37  ;;  %vm244_vm1 = vweird.f32 %v237_v37 }
  0x44   : > { %v518_v38 = vpop.eup %517 }
  0x45   : > { %v239_v39 = vmul.f32 %v518_v38, %v237_v37  ;;  %vm245_vm2 = vweird.f32 %v518_v38 }
  0x46   : > { %vm246_vm3 = vmor %vm244_vm1, %vm245_vm2 }
  0x47   : > { %v240_v40 = vmul.f32 %v518_v38, %v239_v39 }
  0x49   : > { %v241_v41 = vmul.f32 0.5, %v240_v40 }
  0x4b   : > { %v242_v42 = vsub.f32 1.5, %v241_v41 }
  0x4d   : > { %v243_v43 = vmul.f32 %v518_v38, %v242_v42 }
  0x4f   : > { %v247_v44 = vsel %vm246_vm3, %v518_v38, %v243_v43 }
  0x50   : > { %v256_v45 = vmul.f32 %v247_v44, %v221_v21  ;;  %v257_v51 = vmul.f32 %v247_v44, %v222_v22  ;;  %v259_v56 = vmul.f32 %v247_v44, %v224_v26  ;;  %v258_v57 = vmul.f32 %v247_v44, %v223_v23 }
  0x7f   : > { %v298_v47 = vpop.permute.xlu2 %297 }
  0x87   : > { %v302_v55 = vpop.permute.xlu2 %301 }
  0x96   : > { %v278_v46 = vpop.permute.xlu1 %277 }
  0x97   : > { %v270_v48 = vpop.permute.xlu0 %269  ;;  %v286_v60 = vmul.f32 %v278_v46, %v258_v57 }
  0x98   : > { %v284_v49 = vmul.f32 %v270_v48, %v256_v45 }
  0x9a   : > { %v312_v50 = vadd.f32 %v298_v47, %v284_v49 }
  0x9c   : > { %316 = vst [vmem:[%s207_s22] sm:$0x3] %v312_v50 }
  0x9e   : > { %v282_v52 = vpop.permute.xlu1 %281 }
  0x9f   : > { %v274_v53 = vpop.permute.xlu0 %273  ;;  %v287_v59 = vmul.f32 %v282_v52, %v259_v56 }
  0xa0   : > { %v285_v54 = vmul.f32 %v274_v53, %v257_v51 }
  0xa2   : > { %v313_v58 = vadd.f32 %v302_v55, %v285_v54 }
  0xa4   : > { %317 = vst [vmem:[%s207_s22 + $0x2] sm:$0x3] %v313_v58 }
  0xa6   : > { %v310_v61 = vpop.permute.xlu1 %309 }
  0xa7   : > { %v315_v62 = vadd.f32 %v310_v61, %v287_v59  ;;  %v306_v63 = vpop.permute.xlu0 %305 }
  0xa8   : > { %v314_v0 = vadd.f32 %v306_v63, %v286_v60 }
  0xa9   : > { %319 = vst [vmem:[%s207_s22 + $0x6] sm:$0x3] %v315_v62 }
  0xaa   : > { %318 = vst [vmem:[%s207_s22 + $0x4] sm:$0x3] %v314_v0 }
  0xab   : > { %576 = shalt.err (!%p573_p13)
}
  0xac   : > { %s636_s19 = smov 32   ;;  %s637_s28 = smov 2  }
  0xad   : > { %441 = dma.vmem_to_hbm [thread:$0]  (%p709_p9), %s335_s24, 128, %s337_s7, %s321_s15, %s636_s19, %s636_s19, %s637_s28  }
  0xae PF: > { %s351_s29 = sand.u32 1, %s611_s12   ;;  %p448_p0 = pnand %p425_p12, %p716_p11 }
  0xaf   : > { %s352_s22 = scalar_lea.sflag [#allocation4], %s351_s29 }
  0xb0   : > { %p449_p1 = pneg %p448_p0 }
  0xb2   : > { %606 = dma.done.wait (%p449_p1), %s352_s22, 128  }
  0xb3   : > { %608 = vsyncadd (%p449_p1), %s352_s22, 4294967168  ;;  %s19_s17 = sadd.s32 1, %s631_s17   ;;  %s828_s12 = smov %s615_s13 }
  0xb4   : > { %p16_p2 = scmp.ge.s32.totalorder %s19_s17, 4   ;;  %s829_s13 = smov %s619_s14 }
  0xb5   : > { %s830_s14 = smov %s714_s26  ;;  %s831_s15 = smov %s627_s16 }
  0xb6   : > { %s832_s16 = smov %s834_s20  ;;  %18 = sbr.rel (!%p16_p2) target bundleno = 6 (0x6), region = 77 }
  0xbb   :  { %358 = vsyncpa [#allocation3], 1 }
  0xbc   :  { %360 = vsyncpa [#allocation3 + $0x1], 1 }
  0xbd   :  { %361 = vsyncpa [#allocation4], 1 }
  0xbe   :  { %363 = vsyncpa [#allocation4 + $0x1], 1 }

</bundles_post_ra>
